<compile_context>
chip_gen: v7x
topology: tpu7x:2x2x1
jax: 0.10.0
libtpu: 0.0.40
codegen_flags: <defaults>
</compile_context>

<pallas_src>
import functools

import jax
import jax.numpy as jnp
from jax import lax
from jax.experimental import pallas as pl
from jax.experimental.pallas import tpu as pltpu

raw_text = ('We are about to study the idea of a computational process.\n'
            'Computational processes are abstract beings that inhabit computers.\n'
            'As they evolve, processes manipulate other abstract things called data.\n'
            'The evolution of a process is directed by a pattern of rules\n'
            'called a program. People create programs to direct processes. In effect,\n'
            'we conjure the spirits of the computer with our spells.').split()

vocab = sorted(set(raw_text))           # sorted -> deterministic word -> index map
vocab_size = len(vocab)                 # 49 for this text
word_to_ix = {w: i for i, w in enumerate(vocab)}

EMBEDDING_DIM = 32
CONTEXT_SIZE = 2                        # 2 words left + 2 words right -> 4 context words


def _round_up(x, m):
    return ((x + m - 1) // m) * m


def _pick_block_b(batch):
    """Batch tile size: tiny tile for B<=8, otherwise >=2 grid steps (v7x megacore)."""
    b8 = _round_up(batch, 8)
    if b8 <= 8:
        return 8                        # latency path (single CBOW window)
    return min(128, _round_up((b8 + 1) // 2, 8))


def cbow_kernel(idx_ref, emb_ref, wt_ref, b_ref, out_ref):
    # idx_ref: VMEM (Bt, C)  int32    context indices for this batch tile
    # emb_ref: VMEM (Vp, E)  f32      embedding table (zero-padded rows)
    # wt_ref:  VMEM (E, Vp)  f32      linear weight, PRE-TRANSPOSED (in, out) layout
    # b_ref:   VMEM (1, Vp)  f32      linear bias (-1e30 in padded columns)
    # out_ref: VMEM (Bt, Vp) f32      log-probabilities
    Bt, C = idx_ref.shape
    Vp = emb_ref.shape[0]

    idx = idx_ref[...]                                         # (Bt, C) int32
    col_ids = lax.broadcasted_iota(jnp.int32, (Bt, Vp), 1)     # hoisted once

    # One-hot counts of the C context words per row: (Bt, Vp).  Duplicate
    # context indices count twice, matching torch's embedding sum.  Seed from
    # the first compare (no zeros+add).
    onehot = (col_ids == idx[:, 0:1]).astype(jnp.float32)
    for c in range(1, C):                                      # C is small & static
        onehot = onehot + (col_ids == idx[:, c:c + 1]).astype(jnp.float32)

    # Sum of context embeddings via MXU: (Bt, Vp) @ (Vp, E) -> (Bt, E).
    sum_ctx = jnp.dot(onehot, emb_ref[...], preferred_element_type=jnp.float32)

    # Linear layer: weight is already (E, Vp), so a plain matmul with the RHS
    # contraction dim on sublanes (no in-kernel transpose / relayout).
    logits = jnp.dot(sum_ctx, wt_ref[...],
                     preferred_element_type=jnp.float32) + b_ref[...]

    # log_softmax along the vocab axis, in f32.  Padded columns carry a -1e30
    # bias, so they never win the max and contribute exp(~-inf) = 0 to the sum.
    m = jnp.max(logits, axis=-1, keepdims=True)
    s = logits - m
    lse = jnp.log(jnp.sum(jnp.exp(s), axis=-1, keepdims=True))
    out_ref[...] = s - lse


def prepare_cbow_params(emb_weight, lin_weight, lin_bias):
    """Pad + lay out the weights ONCE (hoisted out of the per-call hot path).

    Returns (emb_p, wt_p, b_p) ready for cbow_forward_batch:
      emb_p: (Vp, E) f32, zero-padded rows
      wt_p:  (E, Vp) f32, PRE-TRANSPOSED PyTorch Linear weight, zero-padded cols
      b_p:   (1, Vp) f32, -1e30 in padded vocab columns (softmax mask)
    """
    V, E = emb_weight.shape
    Vp = _round_up(V, 128)              # lane-dense vocab tiles; E is NOT padded
    emb_p = jnp.zeros((Vp, E), jnp.float32).at[:V].set(emb_weight.astype(jnp.float32))
    wt_p = jnp.zeros((E, Vp), jnp.float32).at[:, :V].set(
        jnp.asarray(lin_weight, jnp.float32).T)
    b_p = jnp.full((1, Vp), -1e30, jnp.float32).at[0, :V].set(
        jnp.asarray(lin_bias, jnp.float32))
    return emb_p, wt_p, b_p


@functools.partial(jax.jit, static_argnames=("vocab_out",))
def cbow_forward_batch(indices_bc, emb_p, wt_p, b_p, *, vocab_out):
    """Batched CBOW forward: indices (B, C) int32 + padded params -> log-probs (B, V)."""
    B, C = indices_bc.shape
    Vp, E = emb_p.shape

    block_b = _pick_block_b(B)          # static (shape-derived) at trace time
    Bp = _round_up(B, block_b)

    idx_p = jnp.zeros((Bp, C), jnp.int32).at[:B].set(indices_bc.astype(jnp.int32))

    out = pl.pallas_call(
        cbow_kernel,
        out_shape=jax.ShapeDtypeStruct((Bp, Vp), jnp.float32),
        grid=(Bp // block_b,),
        in_specs=[
            pl.BlockSpec((block_b, C), lambda i: (i, 0)),   # context indices tile
            pl.BlockSpec((Vp, E), lambda i: (0, 0)),        # embedding table (resident)
            pl.BlockSpec((E, Vp), lambda i: (0, 0)),        # linear weight^T (resident)
            pl.BlockSpec((1, Vp), lambda i: (0, 0)),        # linear bias
        ],
        out_specs=pl.BlockSpec((block_b, Vp), lambda i: (i, 0)),
        compiler_params=pltpu.CompilerParams(
            dimension_semantics=("parallel",)),             # shard batch tiles across TCs
    )(idx_p, emb_p, wt_p, b_p)

    return out[:B, :vocab_out]


def cbow_forward(indices, emb_p, wt_p, b_p, *, vocab_out):
    """Single-window forward matching the torch module: (C,) -> (1, V)."""
    return cbow_forward_batch(indices.reshape(1, -1), emb_p, wt_p, b_p,
                              vocab_out=vocab_out)


def cbow_reference_batch(indices_bc, emb_weight, lin_weight, lin_bias):
    embeds = emb_weight[indices_bc]                           # (B, C, E)
    sum_ctx = jnp.sum(embeds, axis=1)                         # (B, E)
    logits = sum_ctx @ lin_weight.T + lin_bias[None, :]       # (B, V)
    return jax.nn.log_softmax(logits, axis=-1)


if __name__ == "__main__":
    key = jax.random.PRNGKey(0)
    k_emb, k_w, k_b = jax.random.split(key, 3)

    # nn.Embedding default init: N(0, 1); nn.Linear default: U(-1/sqrt(in), 1/sqrt(in))
    emb_weight = jax.random.normal(k_emb, (vocab_size, EMBEDDING_DIM), dtype=jnp.float32)
    bound = 1.0 / (EMBEDDING_DIM ** 0.5)
    lin_weight = jax.random.uniform(k_w, (vocab_size, EMBEDDING_DIM),
                                    minval=-bound, maxval=bound, dtype=jnp.float32)
    lin_bias = jax.random.uniform(k_b, (vocab_size,),
                                  minval=-bound, maxval=bound, dtype=jnp.float32)

    # Padded / pre-transposed parameters built ONCE (outside the hot path).
    emb_p, wt_p, b_p = prepare_cbow_params(emb_weight, lin_weight, lin_bias)

    # Build ALL CBOW context windows (2 words each side), batched into one call.
    windows = []
    for t in range(CONTEXT_SIZE, len(raw_text) - CONTEXT_SIZE):
        ctx = [raw_text[t - 2], raw_text[t - 1], raw_text[t + 1], raw_text[t + 2]]
        windows.append([word_to_ix[w] for w in ctx])
    indices_bc = jnp.array(windows, dtype=jnp.int32)          # (B, 4), B = 57

    log_probs = cbow_forward_batch(indices_bc, emb_p, wt_p, b_p, vocab_out=vocab_size)
    jax.block_until_ready(log_probs)

    ref = cbow_reference_batch(indices_bc, emb_weight, lin_weight, lin_bias)
    assert log_probs.shape == (indices_bc.shape[0], vocab_size)
    assert jnp.allclose(log_probs, ref, atol=1e-4, rtol=1e-4)

    # Single-window API (exact torch forward semantics: (C,) -> (1, V)); uses the
    # small 8-row tile instead of padding one row to 128.
    single = cbow_forward(indices_bc[0], emb_p, wt_p, b_p, vocab_out=vocab_size)
    jax.block_until_ready(single)
    assert single.shape == (1, vocab_size)
    assert jnp.allclose(single, ref[0:1], atol=1e-4, rtol=1e-4)

    # TODO(synk): the torch module's print(...) size logging has no kernel equivalent (omitted).
    print("KERNEL_OK")
</pallas_src>

<mosaic_0001>
module attributes {stable_mosaic.version = 11 : i64} {
  func.func @cbow_kernel(%arg0: i32, %arg1: memref<32x4xi32, #tpu.memory_space<vmem>>, %arg2: memref<128x32xf32, #tpu.memory_space<vmem>>, %arg3: memref<32x128xf32, #tpu.memory_space<vmem>>, %arg4: memref<1x128xf32, #tpu.memory_space<vmem>>, %arg5: memref<32x128xf32, #tpu.memory_space<vmem>>) attributes {dimension_semantics = [#tpu.dimension_semantics<parallel>], iteration_bounds = array<i64: 2>, scalar_prefetch = 0 : i64, scratch_operands = 0 : i64, tpu.core_type = #tpu.core_type<tc>, window_params = [{transform_indices = @transform_0, window_bounds = array<i64: 32, 4>}, {pipeline_mode = #tpu.pipeline_mode<synchronous>, transform_indices = @transform_1, window_bounds = array<i64: 128, 32>}, {pipeline_mode = #tpu.pipeline_mode<synchronous>, transform_indices = @transform_2, window_bounds = array<i64: 32, 128>}, {pipeline_mode = #tpu.pipeline_mode<synchronous>, transform_indices = @transform_3, window_bounds = array<i64: 1, 128>}, {transform_indices = @transform_4, window_bounds = array<i64: 32, 128>}]} {
    %c0 = arith.constant 0 : index
    %c0_0 = arith.constant 0 : index
    %0 = vector.load %arg1[%c0, %c0_0] : memref<32x4xi32, #tpu.memory_space<vmem>>, vector<32x4xi32>
    %1 = tpu.iota {dimensions = array<i32: 1>} : vector<32x128xi32>
    %2 = vector.extract_strided_slice %0 {offsets = [0, 0], sizes = [32, 1], strides = [1, 1]} : vector<32x4xi32> to vector<32x1xi32>
    %3 = vector.broadcast %2 : vector<32x1xi32> to vector<32x128xi32>
    %4 = arith.cmpi eq, %1, %3 : vector<32x128xi32>
    %5 = arith.extui %4 : vector<32x128xi1> to vector<32x128xi32>
    %6 = arith.sitofp %5 : vector<32x128xi32> to vector<32x128xf32>
    %7 = vector.extract_strided_slice %0 {offsets = [0, 1], sizes = [32, 1], strides = [1, 1]} : vector<32x4xi32> to vector<32x1xi32>
    %8 = vector.broadcast %7 : vector<32x1xi32> to vector<32x128xi32>
    %9 = arith.cmpi eq, %1, %8 : vector<32x128xi32>
    %10 = arith.extui %9 : vector<32x128xi1> to vector<32x128xi32>
    %11 = arith.sitofp %10 : vector<32x128xi32> to vector<32x128xf32>
    %12 = arith.addf %6, %11 : vector<32x128xf32>
    %13 = vector.extract_strided_slice %0 {offsets = [0, 2], sizes = [32, 1], strides = [1, 1]} : vector<32x4xi32> to vector<32x1xi32>
    %14 = vector.broadcast %13 : vector<32x1xi32> to vector<32x128xi32>
    %15 = arith.cmpi eq, %1, %14 : vector<32x128xi32>
    %16 = arith.extui %15 : vector<32x128xi1> to vector<32x128xi32>
    %17 = arith.sitofp %16 : vector<32x128xi32> to vector<32x128xf32>
    %18 = arith.addf %12, %17 : vector<32x128xf32>
    %19 = vector.extract_strided_slice %0 {offsets = [0, 3], sizes = [32, 1], strides = [1, 1]} : vector<32x4xi32> to vector<32x1xi32>
    %20 = vector.broadcast %19 : vector<32x1xi32> to vector<32x128xi32>
    %21 = arith.cmpi eq, %1, %20 : vector<32x128xi32>
    %22 = arith.extui %21 : vector<32x128xi1> to vector<32x128xi32>
    %23 = arith.sitofp %22 : vector<32x128xi32> to vector<32x128xf32>
    %24 = arith.addf %18, %23 : vector<32x128xf32>
    %c0_1 = arith.constant 0 : index
    %c0_2 = arith.constant 0 : index
    %25 = vector.load %arg2[%c0_1, %c0_2] : memref<128x32xf32, #tpu.memory_space<vmem>>, vector<128x32xf32>
    %cst = arith.constant dense<0.000000e+00> : vector<32x32xf32>
    %26 = tpu.matmul %24, %25, %cst {dimension_numbers = #tpu.dot_dimension_numbers<[1], [0], [0], [1], [0, 0, 1, 1], [], []>} : vector<32x128xf32>, vector<128x32xf32>, vector<32x32xf32> -> vector<32x32xf32>
    %c0_3 = arith.constant 0 : index
    %c0_4 = arith.constant 0 : index
    %27 = vector.load %arg3[%c0_3, %c0_4] : memref<32x128xf32, #tpu.memory_space<vmem>>, vector<32x128xf32>
    %cst_5 = arith.constant dense<0.000000e+00> : vector<32x128xf32>
    %28 = tpu.matmul %26, %27, %cst_5 {dimension_numbers = #tpu.dot_dimension_numbers<[1], [0], [0], [1], [0, 0, 1, 1], [], []>} : vector<32x32xf32>, vector<32x128xf32>, vector<32x128xf32> -> vector<32x128xf32>
    %c0_6 = arith.constant 0 : index
    %c0_7 = arith.constant 0 : index
    %29 = vector.load %arg4[%c0_6, %c0_7] : memref<1x128xf32, #tpu.memory_space<vmem>>, vector<1x128xf32>
    %30 = vector.broadcast %29 : vector<1x128xf32> to vector<32x128xf32>
    %31 = arith.addf %28, %30 : vector<32x128xf32>
    %cst_8 = arith.constant dense<0xFF800000> : vector<32xf32>
    %32 = vector.multi_reduction <maximumf>, %31, %cst_8 [1] : vector<32x128xf32> to vector<32xf32>
    %33 = vector.shape_cast %32 : vector<32xf32> to vector<32x1xf32>
    %34 = vector.broadcast %33 : vector<32x1xf32> to vector<32x128xf32>
    %35 = arith.subf %31, %34 : vector<32x128xf32>
    %36 = math.exp %35 : vector<32x128xf32>
    %cst_9 = arith.constant dense<0.000000e+00> : vector<32xf32>
    %37 = vector.multi_reduction <add>, %36, %cst_9 [1] : vector<32x128xf32> to vector<32xf32>
    %38 = vector.shape_cast %37 : vector<32xf32> to vector<32x1xf32>
    %39 = math.log %38 : vector<32x1xf32>
    %40 = vector.broadcast %39 : vector<32x1xf32> to vector<32x128xf32>
    %41 = arith.subf %35, %40 : vector<32x128xf32>
    %c0_10 = arith.constant 0 : index
    %c0_11 = arith.constant 0 : index
    %42 = vector.load %arg5[%c0_10, %c0_11] : memref<32x128xf32, #tpu.memory_space<vmem>>, vector<32x128xf32>
    tpu.vector_store %arg5[%c0_10, %c0_11], %41 {strides = array<i32>} : memref<32x128xf32, #tpu.memory_space<vmem>>, vector<32x128xf32>,
    return
  }
  func.func @transform_0(%arg0: i32) -> (i32, i32) {
    %c0_i32 = arith.constant 0 : i32
    %c0_i32_0 = arith.constant 0 : i32
    return %arg0, %c0_i32 : i32, i32
  }
  func.func @transform_1(%arg0: i32) -> (i32, i32) {
    %c0_i32 = arith.constant 0 : i32
    %c0_i32_0 = arith.constant 0 : i32
    %c0_i32_1 = arith.constant 0 : i32
    return %c0_i32, %c0_i32_0 : i32, i32
  }
  func.func @transform_2(%arg0: i32) -> (i32, i32) {
    %c0_i32 = arith.constant 0 : i32
    %c0_i32_0 = arith.constant 0 : i32
    %c0_i32_1 = arith.constant 0 : i32
    return %c0_i32, %c0_i32_0 : i32, i32
  }
  func.func @transform_3(%arg0: i32) -> (i32, i32) {
    %c0_i32 = arith.constant 0 : i32
    %c0_i32_0 = arith.constant 0 : i32
    %c0_i32_1 = arith.constant 0 : i32
    return %c0_i32, %c0_i32_0 : i32, i32
  }
  func.func @transform_4(%arg0: i32) -> (i32, i32) {
    %c0_i32 = arith.constant 0 : i32
    %c0_i32_0 = arith.constant 0 : i32
    return %arg0, %c0_i32 : i32, i32
  }
}

</mosaic_0001>

<bundles_post_ra>
// kernel: cbow_forward_batch.1
= control target key start
LH: loop header
LB: loop body
LE: loop exit
PB: predicated region body
PF: predicated region fallthrough
CT: control target
= control target key end

     0   :  { %s858_s15 = smov 0   ;;  %s955_s0 = inlined_call_operand.vmem [shape: s32[64,4], index: 0, kind: input, shape index: {}]   ;;  %s956_s1 = inlined_call_operand.vmem [shape: f32[128,32], index: 1, kind: input, shape index: {}]   ;;  %s957_s2 = inlined_call_operand.vmem [shape: f32[32,128], index: 2, kind: input, shape index: {}]   ;;  %s958_s3 = inlined_call_operand.vmem [shape: f32[1,128], index: 3, kind: input, shape index: {}]   ;;  %s959_s4 = inlined_call_operand.vmem [shape: f32[64,128], index: 4, kind: output, shape index: {}]  }
   0x1 LB: > { %s625_s16 = sadd.s32 4294967295, %s826_s15   ;;  %p629_p0 = scmp.ge.s32.totalorder %s826_s15, 1  ;;  %s826_s15 = sphi %s858_s15, %s14_s15  }
   0x2   : > { %p163_p1 = scmp.lt.s32.totalorder %s826_s15, 3 }
   0x4   : > { %p164_p2 = pnand %p629_p0, %p163_p1 }
   0x5   : > { %s630_s17 = sshll.u32 (!%p164_p2), %s625_s16, 2  ;;  %v315_v0 = vld [vmem:[%s956_s1] sm:$0xff] (!%p164_p2)  ;;  %v828_v1 = vmov (!%p164_p2), 0   ;;  %v316_v2 = vld [vmem:[%s956_s1 + $0x8] sm:$0xff] (!%p164_p2)  ;;  %v317_v3 = vld [vmem:[%s956_s1 + $0x10] sm:$0xff] (!%p164_p2)  ;;  %v829_v15 = vmov (!%p164_p2), 1   ;;  %v205_v38 = vlaneseq (!%p164_p2) }
   0x6   : > { %167 = sbr.rel (%p164_p2) target bundleno = 941 (0x3ad), region = 36  ;;  %792 = vset.pattern.permute.xlu1 (!%p164_p2), %v828_v1  ;;  %790 = vset.pattern.permute.xlu0 (!%p164_p2), %v828_v1  ;;  %p190_p3 = scmp.lt.s32.totalorder (!%p164_p2), %s630_s17, 7  ;;  %v318_v4 = vld [vmem:[%s956_s1 + $0x18] sm:$0xff] (!%p164_p2)  ;;  %v737_v5 = vpack.c.bf16 (!%p164_p2), %v316_v2, %v315_v0  ;;  %v319_v7 = vld [vmem:[%s956_s1 + $0x20] sm:$0xff] (!%p164_p2)  ;;  %v320_v8 = vld [vmem:[%s956_s1 + $0x28] sm:$0xff] (!%p164_p2)  ;;  %v830_v19 = vmov (!%p164_p2), 2  }
   0x7   : > { %v741_v6 = vpack.c.bf16 (!%p164_p2), %v318_v4, %v317_v3  ;;  %v745_v11 = vpack.c.bf16 (!%p164_p2), %v320_v8, %v319_v7  ;;  %v321_v12 = vld [vmem:[%s956_s1 + $0x30] sm:$0xff] (!%p164_p2)  ;;  %v322_v13 = vld [vmem:[%s956_s1 + $0x38] sm:$0xff] (!%p164_p2)  ;;  %v323_v16 = vld [vmem:[%s956_s1 + $0x40] sm:$0xff] (!%p164_p2)  ;;  %v831_v20 = vmov (!%p164_p2), 3   ;;  %v206_v41 = vand.u32 (!%p164_p2), 127, %v205_v38 }
   0x8   : > { %738 = vmatprep.subr.bf16.mxu0 (!%p164_p2), %v737_v5  ;;  %v749_v14 = vpack.c.bf16 (!%p164_p2), %v322_v13, %v321_v12  ;;  %v324_v17 = vld [vmem:[%s956_s1 + $0x48] sm:$0xff] (!%p164_p2)  ;;  %v325_v21 = vld [vmem:[%s956_s1 + $0x50] sm:$0xff] (!%p164_p2)  ;;  %v326_v22 = vld [vmem:[%s956_s1 + $0x58] sm:$0xff] (!%p164_p2)  ;;  %v832_v44 = vmov (!%p164_p2), 0.0  }
   0x9   : > { %740 = vmatpush3.bf16.msra.mxu0 (!%p164_p2), %v737_v5  ;;  %v753_v18 = vpack.c.bf16 (!%p164_p2), %v324_v17, %v323_v16  ;;  %v757_v24 = vpack.c.bf16 (!%p164_p2), %v326_v22, %v325_v21  ;;  %v327_v25 = vld [vmem:[%s956_s1 + $0x60] sm:$0xff] (!%p164_p2)  ;;  %v328_v26 = vld [vmem:[%s956_s1 + $0x68] sm:$0xff] (!%p164_p2)  ;;  %v329_v28 = vld [vmem:[%s956_s1 + $0x70] sm:$0xff] (!%p164_p2) }
   0xa   : > { %742 = vmatprep.subr.bf16.mxu0 (!%p164_p2), %v741_v6  ;;  %v761_v27 = vpack.c.bf16 (!%p164_p2), %v328_v26, %v327_v25  ;;  %v330_v29 = vld [vmem:[%s956_s1 + $0x78] sm:$0xff] (!%p164_p2)  ;;  %v416_v32 = vld [vmem:[%s957_s2] sm:$0xff] (!%p164_p2)  ;;  %v417_v33 = vld [vmem:[%s957_s2 + $0x8] sm:$0xff] (!%p164_p2) }
   0xb   : > { %v765_v30 = vpack.c.bf16 (!%p164_p2), %v330_v29, %v329_v28  ;;  %v418_v34 = vld [vmem:[%s957_s2 + $0x10] sm:$0xff] (!%p164_p2)  ;;  %v769_v35 = vpack.c.bf16 (!%p164_p2), %v417_v33, %v416_v32  ;;  %v419_v36 = vld [vmem:[%s957_s2 + $0x18] sm:$0xff] (!%p164_p2)  ;;  %v650_v25 = vld [vmem:[%s958_s3] ss:$0 sm:$0xff] (!%p164_p2) }
   0xc   : > { %v773_v37 = vpack.c.bf16 (!%p164_p2), %v419_v36, %v418_v34 }
   0xd   : > { %s961_s17 = smov (!%p190_p3, %s630_s17), 7  ;;  %744 = vmatpush3.bf16.msra.mxu0 %v741_v6  ;;  %770 = vmatprep.subr.bf16.mxu1 %v769_v35 }
   0xe   : > { %s631_s26 = sshll.u32 %s961_s17, 3  ;;  %746 = vmatprep.subr.bf16.mxu0 %v745_v11  ;;  %772 = vmatpush3.bf16.msra.mxu1 %v769_v35 }
   0xf   : > { %s888_s29 = scalar_lea.vmem %s955_s0, %s631_s26  ;;  %774 = vmatprep.subr.bf16.mxu1 %v773_v37  ;;  %s199_s19 = scalar_lea.vmem %s959_s4, %s631_s26 }
  0x10   : > { %v202_v9 = vld [vmem:[%s888_s29 + $0x8] sm:$0xff]  ;;  %v201_v10 = vld [vmem:[%s888_s29] sm:$0xff]  ;;  %v203_v23 = vld [vmem:[%s888_s29 + $0x10] sm:$0xff] }
  0x11   : > { %211 = vperm.xlu1 %792, %v202_v9   ;;  %208 = vperm.xlu0 %790, %v201_v10   ;;  %v204_v31 = vld [vmem:[%s888_s29 + $0x18] sm:$0xff] }
  0x12   : > { %748 = vmatpush3.bf16.msra.mxu0 %v745_v11  ;;  %776 = vmatpush3.bf16.msra.mxu1 %v773_v37 }
  0x13   : > { %750 = vmatprep.subr.bf16.mxu0 %v749_v14 }
  0x15   : > { %793 = vset.pattern.permute.xlu1 %v829_v15  ;;  %791 = vset.pattern.permute.xlu0 %v829_v15 }
  0x16   : > { %235 = vperm.xlu1 %793, %v202_v9   ;;  %232 = vperm.xlu0 %791, %v201_v10  }
  0x17   : > { %752 = vmatpush3.bf16.msra.mxu0 %v749_v14 }
  0x18   : > { %754 = vmatprep.subr.bf16.mxu0 %v753_v18 }
  0x1a   : > { %794 = vset.pattern.permute.xlu1 %v830_v19  ;;  %797 = vset.pattern.permute.xlu0 %v831_v20 }
  0x1b   : > { %260 = vperm.xlu1 %794, %v201_v10   ;;  %288 = vperm.xlu0 %797, %v201_v10  }
  0x1c   : > { %756 = vmatpush3.bf16.msra.mxu0 %v753_v18 }
  0x1d   : > { %758 = vmatprep.subr.bf16.mxu0 %v757_v24 }
  0x1f   : > { %795 = vset.pattern.permute.xlu1 %v828_v1  ;;  %291 = vperm.xlu0 %797, %v202_v9  }
  0x20   : > { %214 = vperm.xlu1 %795, %v203_v23   ;;  %760 = vmatpush3.bf16.msra.mxu0 %v757_v24 }
  0x21   : > { %762 = vmatprep.subr.bf16.mxu0 %v761_v27 }
  0x23   : > { %800 = vset.pattern.permute.xlu0 %v830_v19 }
  0x24   : > { %796 = vset.pattern.permute.xlu1 %v829_v15  ;;  %263 = vperm.xlu0 %800, %v202_v9  }
  0x25   : > { %238 = vperm.xlu1 %796, %v203_v23   ;;  %764 = vmatpush3.bf16.msra.mxu0 %v761_v27 }
  0x26   : > { %766 = vmatprep.subr.bf16.mxu0 %v765_v30 }
  0x28   : > { %269 = vperm.xlu0 %800, %v204_v31  }
  0x29   : > { %798 = vset.pattern.permute.xlu1 %v828_v1  ;;  %768 = vmatpush3.bf16.msra.mxu0 %v765_v30 }
  0x2a   : > { %217 = vperm.xlu1 %798, %v204_v31  }
  0x2c   : > { %803 = vset.pattern.permute.xlu0 %v831_v20 }
  0x2e   : > { %799 = vset.pattern.permute.xlu1 %v829_v15 }
  0x2f   : > { %241 = vperm.xlu1 %799, %v204_v31  }
  0x33   : > { %801 = vset.pattern.permute.xlu1 %v830_v19 }
  0x34   : > { %266 = vperm.xlu1 %801, %v203_v23  }
  0x38   : > { %802 = vset.pattern.permute.xlu1 %v831_v20 }
  0x39   : > { %294 = vperm.xlu1 %802, %v203_v23  }
  0x3d   : > { %297 = vperm.xlu1 %802, %v204_v31  }
  0x90   : > { %v212_v39 = vpop.permute.xlu1 %211  ;;  %v209_v40 = vpop.permute.xlu0 %208 }
  0x91   : > { %vm219_vm0 = vcmp.eq.s32.totalorder %v206_v41, %v209_v40  ;;  %vm220_vm5 = vcmp.eq.s32.totalorder %v206_v41, %v212_v39 }
  0x92   : > { %v634_v45 = vsel %vm219_vm0, 1.0, %v832_v44  ;;  %v635_v57 = vsel %vm220_vm5, 1.0, %v832_v44  ;;  %vm427_vm0 = vcmask 261120  }
  0x95   : > { %v236_v42 = vpop.permute.xlu1 %235  ;;  %v233_v43 = vpop.permute.xlu0 %232 }
  0x96   : > { %vm243_vm1 = vcmp.eq.s32.totalorder %v206_v41, %v233_v43  ;;  %vm244_vm4 = vcmp.eq.s32.totalorder %v206_v41, %v236_v42 }
  0x97   : > { %v638_v46 = vsel %vm243_vm1, 1.0, %v832_v44  ;;  %v639_v56 = vsel %vm244_vm4, 1.0, %v832_v44 }
  0x98   : > { %v255_v47 = vadd.f32 %v638_v46, %v634_v45  ;;  %v256_v59 = vadd.f32 %v639_v56, %v635_v57 }
  0x9a   : > { %v261_v48 = vpop.permute.xlu1 %260  ;;  %v289_v49 = vpop.permute.xlu0 %288 }
  0x9b   : > { %vm271_vm2 = vcmp.eq.s32.totalorder %v206_v41, %v261_v48  ;;  %vm299_vm3 = vcmp.eq.s32.totalorder %v206_v41, %v289_v49 }
  0x9c   : > { %v642_v50 = vsel %vm271_vm2, 1.0, %v832_v44  ;;  %v646_v51 = vsel %vm299_vm3, 1.0, %v832_v44 }
  0x9d   : > { %v283_v52 = vadd.f32 %v642_v50, %v255_v47 }
  0x9e   : > { %v292_v53 = vpop.permute.xlu0 %291 }
  0x9f   : > { %v215_v54 = vpop.permute.xlu1 %214  ;;  %v311_v55 = vadd.f32 %v646_v51, %v283_v52  ;;  %vm300_vm6 = vcmp.eq.s32.totalorder %v206_v41, %v292_v53 }
  0xa0   : > { %v647_v61 = vsel %vm300_vm6, 1.0, %v832_v44  ;;  %vm221_vm9 = vcmp.eq.s32.totalorder %v206_v41, %v215_v54 }
  0xa1   : > { %717 = vmatprep.mubr.f32.mxu0 %v311_v55  ;;  %v636_v6 = vsel %vm221_vm9, 1.0, %v832_v44 }
  0xa3   : > { %v264_v58 = vpop.permute.xlu0 %263 }
  0xa4   : > { %vm272_vm7 = vcmp.eq.s32.totalorder %v206_v41, %v264_v58  ;;  %v239_v60 = vpop.permute.xlu1 %238 }
  0xa5   : > { %v643_v62 = vsel %vm272_vm7, 1.0, %v832_v44  ;;  %vm245_vm8 = vcmp.eq.s32.totalorder %v206_v41, %v239_v60 }
  0xa6   : > { %v284_v63 = vadd.f32 %v643_v62, %v256_v59  ;;  %v640_v4 = vsel %vm245_vm8, 1.0, %v832_v44 }
  0xa7   : > { %v270_v5 = vpop.permute.xlu0 %269  ;;  %v257_v9 = vadd.f32 %v640_v4, %v636_v6 }
  0xa8   : > { %v312_v0 = vadd.f32 %v647_v61, %v284_v63  ;;  %vm274_vm13 = vcmp.eq.s32.totalorder %v206_v41, %v270_v5 }
  0xa9   : > { %v218_v1 = vpop.permute.xlu1 %217  ;;  %v645_v14 = vsel %vm274_vm13, 1.0, %v832_v44 }
  0xaa   : > { %718 = vmatmul.mubr.f32.vlgmr.msra.gmra.mrb[0].mxu0 %v312_v0  ;;  %vm222_vm12 = vcmp.eq.s32.totalorder %v206_v41, %v218_v1 }
  0xab   : > { %v637_v10 = vsel %vm222_vm12, 1.0, %v832_v44 }
  0xae   : > { %v242_v2 = vpop.permute.xlu1 %241 }
  0xaf   : > { %vm246_vm10 = vcmp.eq.s32.totalorder %v206_v41, %v242_v2 }
  0xb0   : > { %v641_v7 = vsel %vm246_vm10, 1.0, %v832_v44 }
  0xb1   : > { %v258_v12 = vadd.f32 %v641_v7, %v637_v10 }
  0xb3   : > { %v267_v3 = vpop.permute.xlu1 %266  ;;  %v286_v18 = vadd.f32 %v645_v14, %v258_v12 }
  0xb4   : > { %vm273_vm11 = vcmp.eq.s32.totalorder %v206_v41, %v267_v3 }
  0xb5   : > { %v644_v8 = vsel %vm273_vm11, 1.0, %v832_v44 }
  0xb6   : > { %v285_v13 = vadd.f32 %v644_v8, %v257_v9 }
  0xb8   : > { %v295_v11 = vpop.permute.xlu1 %294 }
  0xb9   : > { %vm301_vm14 = vcmp.eq.s32.totalorder %v206_v41, %v295_v11 }
  0xba   : > { %v648_v15 = vsel %vm301_vm14, 1.0, %v832_v44 }
  0xbb   : > { %v313_v16 = vadd.f32 %v648_v15, %v285_v13 }
  0xbc   : > { %v298_v17 = vpop.permute.xlu1 %297 }
  0xbd   : > { %vm302_vm15 = vcmp.eq.s32.totalorder %v206_v41, %v298_v17  ;;  %720 = vmatprep.mubr.f32.mxu0 %v313_v16 }
  0xbe   : > { %v649_v19 = vsel %vm302_vm15, 1.0, %v832_v44 }
  0xbf   : > { %v314_v20 = vadd.f32 %v649_v19, %v286_v18 }
  0xc1   : > { %721 = vmatmul.mubr.f32.gmra.mrb[2].mxu0 %v314_v20 }
 0x17d   : > { %v719_v21 = vpop.f32.mrb[0].mxu0 }
 0x17e   : > { %v397_v22 = vpop.f32.mrb[1].mxu0 }
 0x17f   : > { %731 = vmatprep.mubr.msk.f32.mxu1 %vm427_vm0, %v397_v22 }
 0x180   : > { %732 = vmatmul.mubr.msk.f32.vlgmr.msra.gmra.mrb[0].mxu1 %vm427_vm0, %v719_v21 }
 0x194   : > { %v722_v23 = vpop.f32.mrb[2].mxu0 }
 0x195   : > { %v407_v24 = vpop.f32.mrb[3].mxu0 }
 0x196   : > { %734 = vmatprep.mubr.msk.f32.mxu1 %vm427_vm0, %v407_v24 }
 0x197   : > { %735 = vmatmul.mubr.msk.f32.gmra.mrb[2].mxu1 %vm427_vm0, %v722_v23 }
 0x253   : > { %v733_v26 = vpop.f32.mrb[0].mxu1 }
 0x254   : > { %v512_v27 = vadd.f32 %v733_v26, %v650_v25  ;;  %v506_v28 = vpop.f32.mrb[1].mxu1 }
 0x255   : > { %v507_v29 = vadd.f32 %v650_v25, %v506_v28 }
 0x256   : > { %527 = vmax.xlane.f32.xlu1 %v512_v27 }
 0x257   : > { %525 = vmax.xlane.f32.xlu0 %v507_v29 }
 0x26a   : > { %v736_v30 = vpop.f32.mrb[2].mxu1 }
 0x26b   : > { %v516_v31 = vpop.f32.mrb[3].mxu1  ;;  %v522_v33 = vadd.f32 %v736_v30, %v650_v25 }
 0x26c   : > { %v517_v32 = vadd.f32 %v650_v25, %v516_v31 }
 0x26e   : > { %529 = vmax.xlane.f32.xlu0 %v517_v32 }
 0x272   : > { %531 = vmax.xlane.f32.xlu0 %v522_v33 }
 0x2e3   : > { %v528_v34 = vpop.xlane.xlu1 %527 }
 0x2e4   : > { %v534_v35 = vsub.f32 %v512_v27, %v528_v34  ;;  %v526_v36 = vpop.xlane.xlu0 %525 }
 0x2e5   : > { %v533_v37 = vsub.f32 %v507_v29, %v526_v36 }
 0x2e6   : > { %v539_v38 = vmul.f32 1.442695, %v534_v35 }
 0x2e7   : > { %v537_v39 = vmul.f32 1.442695, %v533_v37 }
 0x2e8   : > { %804 = vpow2.f32 %v539_v38 }
 0x2e9   : > { %806 = vpow2.f32 %v537_v39 }
 0x2f2   : > { %v805_v40 = vpop.eup %804 }
 0x2f3   : > { %v807_v41 = vpop.eup %806  ;;  %547 = vadd.xlane.f32.xlu0 %v805_v40 }
 0x2f4   : > { %545 = vadd.xlane.f32.xlu1 %v807_v41 }
 0x2fb   : > { %v530_v42 = vpop.xlane.xlu0 %529 }
 0x2fc   : > { %v535_v43 = vsub.f32 %v517_v32, %v530_v42 }
 0x2fe   : > { %v541_v44 = vmul.f32 1.442695, %v535_v43 }
 0x2ff   : > { %v532_v45 = vpop.xlane.xlu0 %531 }
 0x300   : > { %808 = vpow2.f32 %v541_v44  ;;  %v536_v46 = vsub.f32 %v522_v33, %v532_v45 }
 0x302   : > { %v543_v47 = vmul.f32 1.442695, %v536_v46 }
 0x304   : > { %810 = vpow2.f32 %v543_v47 }
 0x30a   : > { %v809_v48 = vpop.eup %808 }
 0x30b   : > { %549 = vadd.xlane.f32.xlu1 %v809_v48 }
 0x30e   : > { %v811_v49 = vpop.eup %810 }
 0x30f   : > { %551 = vadd.xlane.f32.xlu0 %v811_v49 }
 0x380   : > { %v548_v50 = vpop.xlane.xlu0 %547 }
 0x381   : > { %812 = vlog2.f32 %v548_v50  ;;  %v546_v51 = vpop.xlane.xlu1 %545 }
 0x382   : > { %814 = vlog2.f32 %v546_v51 }
 0x38b   : > { %v813_v52 = vpop.eup %812 }
 0x38c   : > { %v815_v53 = vpop.eup %814  ;;  %v556_v54 = vmul.f32 0.6931472, %v813_v52 }
 0x38d   : > { %v554_v55 = vmul.f32 0.6931472, %v815_v53 }
 0x38e   : > { %v562_v57 = vsub.f32 %v534_v35, %v556_v54 }
 0x38f   : > { %v561_v56 = vsub.f32 %v533_v37, %v554_v55 }
 0x390   : > { %566 = vst [vmem:[%s199_s19 + $0x8] sm:$0xff] %v562_v57 }
 0x391   : > { %565 = vst [vmem:[%s199_s19] sm:$0xff] %v561_v56 }
 0x398   : > { %v550_v58 = vpop.xlane.xlu1 %549 }
 0x399   : > { %816 = vlog2.f32 %v550_v58 }
 0x39c   : > { %v552_v59 = vpop.xlane.xlu0 %551 }
 0x39d   : > { %818 = vlog2.f32 %v552_v59 }
 0x3a3   : > { %v817_v60 = vpop.eup %816 }
 0x3a4   : > { %v558_v61 = vmul.f32 0.6931472, %v817_v60 }
 0x3a6   : > { %v563_v62 = vsub.f32 %v535_v43, %v558_v61 }
 0x3a7   : > { %v819_v63 = vpop.eup %818 }
 0x3a8   : > { %567 = vst [vmem:[%s199_s19 + $0x10] sm:$0xff] %v563_v62  ;;  %v560_v0 = vmul.f32 0.6931472, %v819_v63 }
 0x3aa   : > { %v564_v1 = vsub.f32 %v536_v46, %v560_v0 }
 0x3ac   : > { %568 = vst [vmem:[%s199_s19 + $0x18] sm:$0xff] %v564_v1 }
 0x3ad PF: > { %s14_s15 = sadd.s32 1, %s826_s15  }
 0x3ae   : > { %p11_p4 = scmp.ge.s32.totalorder %s14_s15, 4  }
 0x3b0   :  { %13 = sbr.rel (!%p11_p4) target bundleno = 1 (0x1), region = 66 }

</bundles_post_ra>
